<compile_context>
chip_gen: v6e
topology: v6e:2x2x1
jax: 0.10.0
libtpu: 0.0.40
codegen_flags: <defaults>
</compile_context>

<pallas_src>
import functools

import jax
import jax.numpy as jnp
import numpy as np
from jax.experimental import pallas as pl
from jax.experimental.pallas import tpu as pltpu

# Small, forward-consistent shapes (original uses h_dim=800, out_dim=data.shape[1]).
IN_DIM = 2
H_DIM = 128     # multiple of 128 (lane-dense); original 800 should be padded to 768/1024
OUT_DIM = 64    # padded to 128 inside the kernel, sliced back in the wrapper
BATCH = 16

_LANE = 128
_SUBLANE = 8


def _round_up(x, m):
    return (x + m - 1) * m // m if x % m == 0 else ((x + m - 1) // m) * m


def _mlp_kernel(z_ref, w1_ref, b1_ref, w2_ref, b2_ref, w3_ref, b3_ref,
                w4_ref, b4_ref, o_ref):
    z = z_ref[...].astype(jnp.float32)                    # (TB, 2)

    # Layer 1: contraction dim is only 2 -> do it on the VPU as two broadcast
    # multiply-adds instead of pushing a nearly empty (TB,2)x(2,H) MXU matmul.
    w1 = w1_ref[...].astype(jnp.float32)                  # (2, H)
    h = (z[:, 0:1] * w1[0:1, :]
         + z[:, 1:2] * w1[1:2, :]
         + b1_ref[...])
    h = jnp.maximum(h, 0.0)

    # Layers 2/3/4: MXU matmuls; operands in the weights' dtype (f32 or bf16),
    # accumulation always f32.
    h = jnp.dot(h.astype(w2_ref.dtype), w2_ref[...],
                preferred_element_type=jnp.float32) + b2_ref[...]
    h = jnp.maximum(h, 0.0)
    h = jnp.dot(h.astype(w3_ref.dtype), w3_ref[...],
                preferred_element_type=jnp.float32) + b3_ref[...]
    h = jnp.maximum(h, 0.0)
    out = jnp.dot(h.astype(w4_ref.dtype), w4_ref[...],
                  preferred_element_type=jnp.float32) + b4_ref[...]

    o_ref[...] = out.astype(o_ref.dtype)                  # lane-dense 128-wide store


def generator_forward(z, params, *, compute_dtype=jnp.float32, max_tb=256):
    """z: (B, 2) float32 -> (B, OUT_DIM) float32.

    compute_dtype: dtype for the wide matmul operands (weights + activations).
      Use jnp.bfloat16 on v6e/v7x for MXU throughput & halved weight DMA;
      accumulation is always float32.
    """
    w1, b1, w2, b2, w3, b3, w4, b4 = params
    B, in_dim = z.shape
    assert in_dim == IN_DIM
    h_dim = w1.shape[1]
    out_dim = w4.shape[1]

    # Lane-dense padded output width (multiple of 128) -> unmasked vst.
    out_pad = _round_up(out_dim, _LANE)

    # Batch tile: whole (8-aligned) batch in one grid step when small,
    # otherwise max_tb-row tiles (128-256 saturates the MXU rows).
    if B <= max_tb:
        tb = _round_up(B, _SUBLANE)
    else:
        tb = max_tb
    b_pad = _round_up(B, tb)

    z_p = z if b_pad == B else jnp.pad(z, ((0, b_pad - B), (0, 0)))

    # Cast the wide-matmul weights to the compute dtype; pad layer-4 weight and
    # bias out to the lane-dense output width. Biases / w1 stay f32 (tiny, VPU).
    w1c = w1.astype(jnp.float32)
    w2c = w2.astype(compute_dtype)
    w3c = w3.astype(compute_dtype)
    w4c = jnp.pad(w4, ((0, 0), (0, out_pad - out_dim))).astype(compute_dtype)
    b4c = jnp.pad(b4, ((0, 0), (0, out_pad - out_dim))).astype(jnp.float32)

    grid = (b_pad // tb,)

    # Weights/biases: full-array blocks, same block every grid step (resident).
    def full_spec(shape):
        return pl.BlockSpec(shape, lambda i: (0, 0))

    out = pl.pallas_call(
        _mlp_kernel,
        out_shape=jax.ShapeDtypeStruct((b_pad, out_pad), jnp.float32),
        grid_spec=pltpu.PrefetchScalarGridSpec(
            num_scalar_prefetch=0,
            grid=grid,
            in_specs=[
                pl.BlockSpec((tb, IN_DIM), lambda i: (i, 0)),      # z tile
                full_spec((IN_DIM, h_dim)), full_spec((1, h_dim)),  # w1, b1
                full_spec((h_dim, h_dim)), full_spec((1, h_dim)),   # w2, b2
                full_spec((h_dim, h_dim)), full_spec((1, h_dim)),   # w3, b3
                full_spec((h_dim, out_pad)), full_spec((1, out_pad)),  # w4, b4
            ],
            out_specs=pl.BlockSpec((tb, out_pad), lambda i: (i, 0)),
        ),
        compiler_params=pltpu.CompilerParams(
            dimension_semantics=("parallel",)),
    )(z_p, w1c, b1, w2c, b2, w3c, b3, w4c, b4c)

    return out[:B, :out_dim]


def init_params(key):
    """Deterministic init mimicking nn.Linear default (U[-1/sqrt(fan_in), +])."""
    def linear(key, fan_in, fan_out):
        kw, kb = jax.random.split(key)
        bound = 1.0 / np.sqrt(fan_in)
        w = jax.random.uniform(kw, (fan_in, fan_out), jnp.float32, -bound, bound)
        b = jax.random.uniform(kb, (1, fan_out), jnp.float32, -bound, bound)
        return w, b

    k1, k2, k3, k4 = jax.random.split(key, 4)
    w1, b1 = linear(k1, IN_DIM, H_DIM)
    w2, b2 = linear(k2, H_DIM, H_DIM)
    w3, b3 = linear(k3, H_DIM, H_DIM)
    w4, b4 = linear(k4, H_DIM, OUT_DIM)
    return (w1, b1, w2, b2, w3, b3, w4, b4)


def reference_forward(z, params):
    w1, b1, w2, b2, w3, b3, w4, b4 = params
    h = jnp.maximum(z @ w1 + b1, 0.0)
    h = jnp.maximum(h @ w2 + b2, 0.0)
    h = jnp.maximum(h @ w3 + b3, 0.0)
    return h @ w4 + b4


if __name__ == "__main__":
    key = jax.random.PRNGKey(0)
    kz, kp, kz2 = jax.random.split(key, 3)
    params = init_params(kp)

    # --- Small batch: single grid step over the whole batch, f32 path ---
    z = jax.random.normal(kz, (BATCH, IN_DIM), jnp.float32)
    out = jax.block_until_ready(generator_forward(z, params,
                                                  compute_dtype=jnp.float32))
    ref = reference_forward(z, params)
    assert out.shape == (BATCH, OUT_DIM)
    np.testing.assert_allclose(np.asarray(out), np.asarray(ref),
                               rtol=1e-5, atol=1e-5)

    # --- Larger batch: exercises 256-row tiling + grid, bf16 weight path ---
    B2 = 512
    z2 = jax.random.normal(kz2, (B2, IN_DIM), jnp.float32)
    out2_f32 = jax.block_until_ready(generator_forward(z2, params,
                                                       compute_dtype=jnp.float32))
    ref2 = reference_forward(z2, params)
    np.testing.assert_allclose(np.asarray(out2_f32), np.asarray(ref2),
                               rtol=1e-5, atol=1e-5)

    out2_bf16 = jax.block_until_ready(generator_forward(z2, params,
                                                        compute_dtype=jnp.bfloat16))
    np.testing.assert_allclose(np.asarray(out2_bf16), np.asarray(ref2),
                               rtol=5e-2, atol=5e-2)

    print("KERNEL_OK")
</pallas_src>

<mosaic_0001>
module attributes {stable_mosaic.version = 11 : i64} {
  func.func @_mlp_kernel(%arg0: i32, %arg1: memref<23x2xf32, #tpu.memory_space<vmem>>, %arg2: memref<2x128xf32, #tpu.memory_space<vmem>>, %arg3: memref<1x128xf32, #tpu.memory_space<vmem>>, %arg4: memref<128x128xf32, #tpu.memory_space<vmem>>, %arg5: memref<1x128xf32, #tpu.memory_space<vmem>>, %arg6: memref<128x128xf32, #tpu.memory_space<vmem>>, %arg7: memref<1x128xf32, #tpu.memory_space<vmem>>, %arg8: memref<128x128xf32, #tpu.memory_space<vmem>>, %arg9: memref<1x128xf32, #tpu.memory_space<vmem>>, %arg10: memref<23x128xf32, #tpu.memory_space<vmem>>) attributes {dimension_semantics = [#tpu.dimension_semantics<parallel>], iteration_bounds = array<i64: 1>, scalar_prefetch = 0 : i64, scratch_operands = 0 : i64, tpu.core_type = #tpu.core_type<tc>, window_params = [{transform_indices = @transform_0, window_bounds = array<i64: 23, 2>}, {pipeline_mode = #tpu.pipeline_mode<synchronous>, transform_indices = @transform_1, window_bounds = array<i64: 2, 128>}, {pipeline_mode = #tpu.pipeline_mode<synchronous>, transform_indices = @transform_2, window_bounds = array<i64: 1, 128>}, {pipeline_mode = #tpu.pipeline_mode<synchronous>, transform_indices = @transform_3, window_bounds = array<i64: 128, 128>}, {pipeline_mode = #tpu.pipeline_mode<synchronous>, transform_indices = @transform_4, window_bounds = array<i64: 1, 128>}, {pipeline_mode = #tpu.pipeline_mode<synchronous>, transform_indices = @transform_5, window_bounds = array<i64: 128, 128>}, {pipeline_mode = #tpu.pipeline_mode<synchronous>, transform_indices = @transform_6, window_bounds = array<i64: 1, 128>}, {pipeline_mode = #tpu.pipeline_mode<synchronous>, transform_indices = @transform_7, window_bounds = array<i64: 128, 128>}, {pipeline_mode = #tpu.pipeline_mode<synchronous>, transform_indices = @transform_8, window_bounds = array<i64: 1, 128>}, {transform_indices = @transform_9, window_bounds = array<i64: 23, 128>}]} {
    %c0 = arith.constant 0 : index
    %c0_0 = arith.constant 0 : index
    %0 = vector.load %arg1[%c0, %c0_0] : memref<23x2xf32, #tpu.memory_space<vmem>>, vector<23x2xf32>
    %c0_1 = arith.constant 0 : index
    %c0_2 = arith.constant 0 : index
    %1 = vector.load %arg2[%c0_1, %c0_2] : memref<2x128xf32, #tpu.memory_space<vmem>>, vector<2x128xf32>
    %2 = vector.extract_strided_slice %0 {offsets = [0, 0], sizes = [23, 1], strides = [1, 1]} : vector<23x2xf32> to vector<23x1xf32>
    %3 = vector.extract_strided_slice %1 {offsets = [0, 0], sizes = [1, 128], strides = [1, 1]} : vector<2x128xf32> to vector<1x128xf32>
    %4 = vector.broadcast %2 : vector<23x1xf32> to vector<23x128xf32>
    %5 = vector.broadcast %3 : vector<1x128xf32> to vector<23x128xf32>
    %6 = arith.mulf %4, %5 : vector<23x128xf32>
    %7 = vector.extract_strided_slice %0 {offsets = [0, 1], sizes = [23, 1], strides = [1, 1]} : vector<23x2xf32> to vector<23x1xf32>
    %8 = vector.extract_strided_slice %1 {offsets = [1, 0], sizes = [1, 128], strides = [1, 1]} : vector<2x128xf32> to vector<1x128xf32>
    %9 = vector.broadcast %7 : vector<23x1xf32> to vector<23x128xf32>
    %10 = vector.broadcast %8 : vector<1x128xf32> to vector<23x128xf32>
    %11 = arith.mulf %9, %10 : vector<23x128xf32>
    %12 = arith.addf %6, %11 : vector<23x128xf32>
    %c0_3 = arith.constant 0 : index
    %c0_4 = arith.constant 0 : index
    %13 = vector.load %arg3[%c0_3, %c0_4] : memref<1x128xf32, #tpu.memory_space<vmem>>, vector<1x128xf32>
    %14 = vector.broadcast %13 : vector<1x128xf32> to vector<23x128xf32>
    %15 = arith.addf %12, %14 : vector<23x128xf32>
    %cst = arith.constant 0.000000e+00 : f32
    %16 = vector.broadcast %cst : f32 to vector<23x128xf32>
    %17 = arith.maximumf %15, %16 : vector<23x128xf32>
    %c0_5 = arith.constant 0 : index
    %c0_6 = arith.constant 0 : index
    %18 = vector.load %arg4[%c0_5, %c0_6] : memref<128x128xf32, #tpu.memory_space<vmem>>, vector<128x128xf32>
    %cst_7 = arith.constant dense<0.000000e+00> : vector<23x128xf32>
    %19 = tpu.matmul %17, %18, %cst_7 {dimension_numbers = #tpu.dot_dimension_numbers<[1], [0], [0], [1], [0, 0, 1, 1], [], []>} : vector<23x128xf32>, vector<128x128xf32>, vector<23x128xf32> -> vector<23x128xf32>
    %c0_8 = arith.constant 0 : index
    %c0_9 = arith.constant 0 : index
    %20 = vector.load %arg5[%c0_8, %c0_9] : memref<1x128xf32, #tpu.memory_space<vmem>>, vector<1x128xf32>
    %21 = vector.broadcast %20 : vector<1x128xf32> to vector<23x128xf32>
    %22 = arith.addf %19, %21 : vector<23x128xf32>
    %cst_10 = arith.constant 0.000000e+00 : f32
    %23 = vector.broadcast %cst_10 : f32 to vector<23x128xf32>
    %24 = arith.maximumf %22, %23 : vector<23x128xf32>
    %c0_11 = arith.constant 0 : index
    %c0_12 = arith.constant 0 : index
    %25 = vector.load %arg6[%c0_11, %c0_12] : memref<128x128xf32, #tpu.memory_space<vmem>>, vector<128x128xf32>
    %cst_13 = arith.constant dense<0.000000e+00> : vector<23x128xf32>
    %26 = tpu.matmul %24, %25, %cst_13 {dimension_numbers = #tpu.dot_dimension_numbers<[1], [0], [0], [1], [0, 0, 1, 1], [], []>} : vector<23x128xf32>, vector<128x128xf32>, vector<23x128xf32> -> vector<23x128xf32>
    %c0_14 = arith.constant 0 : index
    %c0_15 = arith.constant 0 : index
    %27 = vector.load %arg7[%c0_14, %c0_15] : memref<1x128xf32, #tpu.memory_space<vmem>>, vector<1x128xf32>
    %28 = vector.broadcast %27 : vector<1x128xf32> to vector<23x128xf32>
    %29 = arith.addf %26, %28 : vector<23x128xf32>
    %cst_16 = arith.constant 0.000000e+00 : f32
    %30 = vector.broadcast %cst_16 : f32 to vector<23x128xf32>
    %31 = arith.maximumf %29, %30 : vector<23x128xf32>
    %c0_17 = arith.constant 0 : index
    %c0_18 = arith.constant 0 : index
    %32 = vector.load %arg8[%c0_17, %c0_18] : memref<128x128xf32, #tpu.memory_space<vmem>>, vector<128x128xf32>
    %cst_19 = arith.constant dense<0.000000e+00> : vector<23x128xf32>
    %33 = tpu.matmul %31, %32, %cst_19 {dimension_numbers = #tpu.dot_dimension_numbers<[1], [0], [0], [1], [0, 0, 1, 1], [], []>} : vector<23x128xf32>, vector<128x128xf32>, vector<23x128xf32> -> vector<23x128xf32>
    %c0_20 = arith.constant 0 : index
    %c0_21 = arith.constant 0 : index
    %34 = vector.load %arg9[%c0_20, %c0_21] : memref<1x128xf32, #tpu.memory_space<vmem>>, vector<1x128xf32>
    %35 = vector.broadcast %34 : vector<1x128xf32> to vector<23x128xf32>
    %36 = arith.addf %33, %35 : vector<23x128xf32>
    %c0_22 = arith.constant 0 : index
    %c0_23 = arith.constant 0 : index
    %37 = vector.load %arg10[%c0_22, %c0_23] : memref<23x128xf32, #tpu.memory_space<vmem>>, vector<23x128xf32>
    tpu.vector_store %arg10[%c0_22, %c0_23], %36 {strides = array<i32>} : memref<23x128xf32, #tpu.memory_space<vmem>>, vector<23x128xf32>,
    return
  }
  func.func @transform_0(%arg0: i32) -> (i32, i32) {
    %c0_i32 = arith.constant 0 : i32
    %c0_i32_0 = arith.constant 0 : i32
    return %arg0, %c0_i32 : i32, i32
  }
  func.func @transform_1(%arg0: i32) -> (i32, i32) {
    %c0_i32 = arith.constant 0 : i32
    %c0_i32_0 = arith.constant 0 : i32
    %c0_i32_1 = arith.constant 0 : i32
    return %c0_i32, %c0_i32_0 : i32, i32
  }
  func.func @transform_2(%arg0: i32) -> (i32, i32) {
    %c0_i32 = arith.constant 0 : i32
    %c0_i32_0 = arith.constant 0 : i32
    %c0_i32_1 = arith.constant 0 : i32
    return %c0_i32, %c0_i32_0 : i32, i32
  }
  func.func @transform_3(%arg0: i32) -> (i32, i32) {
    %c0_i32 = arith.constant 0 : i32
    %c0_i32_0 = arith.constant 0 : i32
    %c0_i32_1 = arith.constant 0 : i32
    return %c0_i32, %c0_i32_0 : i32, i32
  }
  func.func @transform_4(%arg0: i32) -> (i32, i32) {
    %c0_i32 = arith.constant 0 : i32
    %c0_i32_0 = arith.constant 0 : i32
    %c0_i32_1 = arith.constant 0 : i32
    return %c0_i32, %c0_i32_0 : i32, i32
  }
  func.func @transform_5(%arg0: i32) -> (i32, i32) {
    %c0_i32 = arith.constant 0 : i32
    %c0_i32_0 = arith.constant 0 : i32
    %c0_i32_1 = arith.constant 0 : i32
    return %c0_i32, %c0_i32_0 : i32, i32
  }
  func.func @transform_6(%arg0: i32) -> (i32, i32) {
    %c0_i32 = arith.constant 0 : i32
    %c0_i32_0 = arith.constant 0 : i32
    %c0_i32_1 = arith.constant 0 : i32
    return %c0_i32, %c0_i32_0 : i32, i32
  }
  func.func @transform_7(%arg0: i32) -> (i32, i32) {
    %c0_i32 = arith.constant 0 : i32
    %c0_i32_0 = arith.constant 0 : i32
    %c0_i32_1 = arith.constant 0 : i32
    return %c0_i32, %c0_i32_0 : i32, i32
  }
  func.func @transform_8(%arg0: i32) -> (i32, i32) {
    %c0_i32 = arith.constant 0 : i32
    %c0_i32_0 = arith.constant 0 : i32
    %c0_i32_1 = arith.constant 0 : i32
    return %c0_i32, %c0_i32_0 : i32, i32
  }
  func.func @transform_9(%arg0: i32) -> (i32, i32) {
    %c0_i32 = arith.constant 0 : i32
    %c0_i32_0 = arith.constant 0 : i32
    return %arg0, %c0_i32 : i32, i32
  }
}

</mosaic_0001>

<bundles_post_ra>
// kernel: tpu_custom_call.1
= control target key start
LH: loop header
LB: loop body
LE: loop exit
PB: predicated region body
PF: predicated region fallthrough
CT: control target
= control target key end

     0   :  { %14 = vsyncpa [#allocation3], 0  ;;  %s978_s0 = inlined_call_operand.vmem [shape: f32[23,2], index: 0, kind: input, shape index: {}]   ;;  %s979_s1 = inlined_call_operand.vmem [shape: f32[2,128], index: 1, kind: input, shape index: {}]   ;;  %s980_s2 = inlined_call_operand.vmem [shape: f32[1,128], index: 2, kind: input, shape index: {}]   ;;  %s981_s3 = inlined_call_operand.hbm [shape: f32[128,128], index: 3, kind: input, shape index: {}]   ;;  %s982_s4 = inlined_call_operand.vmem [shape: f32[1,128], index: 4, kind: input, shape index: {}]   ;;  %s983_s5 = inlined_call_operand.hbm [shape: f32[128,128], index: 5, kind: input, shape index: {}]   ;;  %s984_s6 = inlined_call_operand.vmem [shape: f32[1,128], index: 6, kind: input, shape index: {}]   ;;  %s985_s7 = inlined_call_operand.hbm [shape: f32[128,128], index: 7, kind: input, shape index: {}]   ;;  %s986_s8 = inlined_call_operand.vmem [shape: f32[1,128], index: 8, kind: input, shape index: {}]   ;;  %s987_s9 = inlined_call_operand.hbm [shape: f32[23,128], index: 9, kind: output, shape index: {}]  }
   0x1   :  { %15 = vsyncpa [#allocation6], 0 }
   0x2   :  { %16 = vsyncpa [#allocation4], 0  ;;  %s788_s30 = smov [#allocation5]   ;;  %s789_s11 = smov [#allocation2]  }
   0x3   :  { %s42_s10 = sshll.u32 %s788_s30, 4  ;;  %s28_s12 = sshll.u32 %s789_s11, 4  ;;  %s43_s10 = int_to_ptr.vmem [resolvable:$true] %s42_s10  ;;  %s29_s12 = int_to_ptr.vmem [resolvable:$true] %s28_s12 }
   0x4   :  { %s710_s13 = scalar_lea.vmem %s43_s10, 2048  ;;  %p715_p1 = scmp.lt.s32.totalorder %s43_s10, %s43_s10 }
   0x5   :  { %p711_p0 = scmp.ne.s32.totalorder %s43_s10, %s710_s13  ;;  %p716_p2 = scmp.lt.s32.totalorder %s710_s13, %s710_s13 }
   0x7   :  { %p717_p3 = por %p716_p2, %p715_p1 }
   0x9   :  { %p718_p4 = pnand %p717_p3, %p711_p0 }
   0xb   :  { %721 = shalt.err (!%p718_p4)
}
   0xc   :  { %s790_s14 = smov 128   ;;  %s791_s15 = smov 8  }
   0xd   :  { %48 = dma.hbm_to_vmem [thread:$0]  %s983_s5, 2048, %s43_s10, [#allocation6], %s790_s14, %s790_s14, %s791_s15  }
   0xe   :  { %s730_s18 = scalar_lea.vmem %s29_s12, 2048  ;;  %p735_p6 = scmp.lt.s32.totalorder %s29_s12, %s29_s12 }
   0xf   :  { %p731_p5 = scmp.ne.s32.totalorder %s29_s12, %s730_s18  ;;  %p736_p7 = scmp.lt.s32.totalorder %s730_s18, %s730_s18 }
  0x11   :  { %p737_p8 = por %p736_p7, %p735_p6 }
  0x13   :  { %p738_p9 = pnand %p737_p8, %p731_p5 }
  0x15   :  { %741 = shalt.err (!%p738_p9)
}
  0x16   :  { %34 = dma.hbm_to_vmem [thread:$0]  %s981_s3, 2048, %s29_s12, [#allocation3], %s790_s14, %s790_s14, %s791_s15  }
  0x17   :  { %s792_s21 = smov [#allocation7]  }
  0x18   :  { %s56_s22 = sshll.u32 %s792_s21, 4  ;;  %s57_s22 = int_to_ptr.vmem [resolvable:$true] %s56_s22 }
  0x19   :  { %s750_s23 = scalar_lea.vmem %s57_s22, 2048  ;;  %p755_p11 = scmp.lt.s32.totalorder %s57_s22, %s57_s22 }
  0x1a   :  { %p751_p10 = scmp.ne.s32.totalorder %s57_s22, %s750_s23  ;;  %p756_p12 = scmp.lt.s32.totalorder %s750_s23, %s750_s23 }
  0x1c   :  { %p757_p13 = por %p756_p12, %p755_p11 }
  0x1e   :  { %p758_p0 = pnand %p757_p13, %p751_p10 }
  0x20   :  { %761 = shalt.err (!%p758_p0)
}
  0x21   :  { %62 = dma.hbm_to_vmem [thread:$0]  %s985_s7, 2048, %s57_s22, [#allocation6], %s790_s14, %s790_s14, %s791_s15  }
  0x22   :  { %782 = dma.done.wait [#allocation3], 2048  }
  0x23   :  { %783 = vsyncadd [#allocation3], 4294965248 }
  0x24   :  { %784 = dma.done.wait [#allocation6], 4096  }
  0x25   :  { %785 = vsyncadd [#allocation6], 4294963200  ;;  %v793_v0 = vmov 0   ;;  %v794_v1 = vmov 0.0   ;;  %v75_v2 = vld [vmem:[%s978_s0 + $0x8] sm:$0xff]  ;;  %v74_v3 = vld [vmem:[%s978_s0] sm:$0xff]  ;;  %v93_v35 = vlaneseq }
  0x26   :  { %699 = vset.pattern.permute.xlu1 %v793_v0  ;;  %697 = vset.pattern.permute.xlu0 %v793_v0  ;;  %v150_v4 = vld [vmem:[#allocation2 + $0x78] sm:$0xff]  ;;  %v149_v5 = vld [vmem:[#allocation2 + $0x70] sm:$0xff]  ;;  %v795_v6 = vmov 1   ;;  %v148_v7 = vld [vmem:[#allocation2 + $0x68] sm:$0xff]  ;;  %vm796_vm0 = vmmov 0   ;;  %s797_s13 = smov [#allocation8]  }
  0x27   :  { %532 = vmatprep.subr.mxu0 %v794_v1  ;;  %573 = vmatprep.subr.mxu1 %v794_v1  ;;  %v76_v8 = vld [vmem:[%s978_s0 + $0x10] sm:$0x7f]  ;;  %v147_v9 = vld [vmem:[#allocation2 + $0x60] sm:$0xff]  ;;  %v146_v10 = vld [vmem:[#allocation2 + $0x58] sm:$0xff]  ;;  %v94_v36 = vshrl.u32 %v93_v35, 7  ;;  %s458_s16 = sshll.u32 %s797_s13, 4  ;;  %s459_s16 = int_to_ptr.vmem [resolvable:$true] %s458_s16 }
  0x28   :  { %85 = vperm.xlu1 %699, %v75_v2   ;;  %80 = vperm.xlu0 %697, %v74_v3   ;;  %v145_v11 = vld [vmem:[#allocation2 + $0x50] sm:$0xff]  ;;  %v144_v12 = vld [vmem:[#allocation2 + $0x48] sm:$0xff]  ;;  %v143_v13 = vld [vmem:[#allocation2 + $0x40] sm:$0xff]  ;;  %s762_s17 = scalar_lea.vmem %s459_s16, 384  ;;  %p767_p2 = scmp.lt.s32.totalorder %s459_s16, %s459_s16 }
  0x29   :  { %533 = vmatpush3.msra.mxu0 %v150_v4  ;;  %564 = vmatprep.mubr.msk.f32.mxu0 %vm796_vm0, %v794_v1  ;;  %v142_v14 = vld [vmem:[#allocation2 + $0x38] sm:$0xff]  ;;  %v255_v16 = vld [vmem:[#allocation5 + $0x70] sm:$0xff]  ;;  %v254_v18 = vld [vmem:[#allocation5 + $0x68] sm:$0xff]  ;;  %v95_v37 = vsub.s32 0, %v94_v36  ;;  %v114_v38 = vsub.s32 1, %v94_v36  ;;  %p763_p1 = scmp.ne.s32.totalorder %s459_s16, %s762_s17  ;;  %p768_p3 = scmp.lt.s32.totalorder %s762_s17, %s762_s17 }
  0x2a   :  { %534 = vmatprep.subr.mxu0 %v794_v1  ;;  %605 = vmatprep.mubr.msk.f32.mxu1 %vm796_vm0, %v794_v1  ;;  %v256_v15 = vld [vmem:[#allocation5 + $0x78] sm:$0xff]  ;;  %v141_v17 = vld [vmem:[#allocation2 + $0x30] sm:$0xff]  ;;  %v140_v19 = vld [vmem:[#allocation2 + $0x28] sm:$0xff] }
  0x2b   :  { %535 = vmatpush3.msra.mxu0 %v149_v5  ;;  %574 = vmatpush3.msra.mxu1 %v256_v15  ;;  %v253_v20 = vld [vmem:[#allocation5 + $0x60] sm:$0xff]  ;;  %v252_v22 = vld [vmem:[#allocation5 + $0x58] sm:$0xff]  ;;  %v251_v24 = vld [vmem:[#allocation5 + $0x50] sm:$0xff]  ;;  %p769_p4 = por %p768_p3, %p767_p2 }
  0x2c   :  { %700 = vset.pattern.permute.xlu1 %v795_v6  ;;  %698 = vset.pattern.permute.xlu0 %v795_v6  ;;  %v139_v21 = vld [vmem:[#allocation2 + $0x20] sm:$0xff]  ;;  %v138_v23 = vld [vmem:[#allocation2 + $0x18] sm:$0xff]  ;;  %v137_v25 = vld [vmem:[#allocation2 + $0x10] sm:$0xff] }
  0x2d   :  { %105 = vperm.xlu1 %700, %v75_v2   ;;  %101 = vperm.xlu0 %698, %v74_v3   ;;  %v250_v26 = vld [vmem:[#allocation5 + $0x48] sm:$0xff]  ;;  %v249_v28 = vld [vmem:[#allocation5 + $0x40] sm:$0xff]  ;;  %v248_v30 = vld [vmem:[#allocation5 + $0x38] sm:$0xff]  ;;  %p770_p5 = pnand %p769_p4, %p763_p1 }
  0x2e   :  { %536 = vmatprep.subr.mxu0 %v794_v1  ;;  %575 = vmatprep.subr.mxu1 %v794_v1  ;;  %v136_v27 = vld [vmem:[#allocation2 + $0x8] sm:$0xff]  ;;  %v135_v29 = vld [vmem:[#allocation2] sm:$0xff]  ;;  %v247_v31 = vld [vmem:[#allocation5 + $0x30] sm:$0xff] }
  0x2f   :  { %537 = vmatpush3.msra.mxu0 %v148_v7  ;;  %576 = vmatpush3.msra.mxu1 %v255_v16  ;;  %v246_v32 = vld [vmem:[#allocation5 + $0x28] sm:$0xff]  ;;  %v245_v33 = vld [vmem:[#allocation5 + $0x20] sm:$0xff]  ;;  %v244_v34 = vld [vmem:[#allocation5 + $0x18] sm:$0xff] }
  0x30   :  { %538 = vmatprep.subr.mxu0 %v794_v1  ;;  %577 = vmatprep.subr.mxu1 %v794_v1  ;;  %v77_v39 = vld [vmem:[%s979_s1] sm:$0x3]  ;;  %v242_v2 = vld [vmem:[#allocation5 + $0x8] sm:$0xff]  ;;  %v362_v4 = vld [vmem:[#allocation7 + $0x78] sm:$0xff] }
  0x31   :  { %701 = vset.pattern.permute.xlu1 %v793_v0  ;;  %109 = vperm.xlu0 %698, %v76_v8   ;;  %v96_v42 = vrot.slane %v77_v39, %v95_v37  ;;  %v115_v43 = vrot.slane %v77_v39, %v114_v38  ;;  %v471_v50 = vld [vmem:[%s980_s2] ss:$0 sm:$0xff]  ;;  %v243_v0 = vld [vmem:[#allocation5 + $0x10] sm:$0xff]  ;;  %v360_v6 = vld [vmem:[#allocation7 + $0x68] sm:$0xff] }
  0x32   :  { %90 = vperm.xlu1 %701, %v76_v8   ;;  %539 = vmatpush3.msra.mxu0 %v147_v9  ;;  %v241_v3 = vld [vmem:[#allocation5] sm:$0xff]  ;;  %v361_v5 = vld [vmem:[#allocation7 + $0x70] sm:$0xff]  ;;  %v358_v8 = vld [vmem:[#allocation7 + $0x58] sm:$0xff] }
  0x33   :  { %540 = vmatprep.subr.mxu0 %v794_v1  ;;  %578 = vmatpush3.msra.mxu1 %v254_v18  ;;  %v359_v7 = vld [vmem:[#allocation7 + $0x60] sm:$0xff]  ;;  %v357_v9 = vld [vmem:[#allocation7 + $0x50] sm:$0xff]  ;;  %v350_v16 = vld [vmem:[#allocation7 + $0x18] sm:$0xff] }
  0x34   :  { %541 = vmatpush3.msra.mxu0 %v146_v10  ;;  %579 = vmatprep.subr.mxu1 %v794_v1  ;;  %v356_v10 = vld [vmem:[#allocation7 + $0x48] sm:$0xff]  ;;  %v351_v15 = vld [vmem:[#allocation7 + $0x20] sm:$0xff] }
  0x35   :  { %542 = vmatprep.subr.mxu0 %v794_v1  ;;  %580 = vmatpush3.msra.mxu1 %v253_v20 }
  0x36   :  { %543 = vmatpush3.msra.mxu0 %v145_v11  ;;  %581 = vmatprep.subr.mxu1 %v794_v1  ;;  %v355_v11 = vld [vmem:[#allocation7 + $0x40] sm:$0xff] }
  0x37   :  { %544 = vmatprep.subr.mxu0 %v794_v1  ;;  %582 = vmatpush3.msra.mxu1 %v252_v22 }
  0x38   :  { %545 = vmatpush3.msra.mxu0 %v144_v12  ;;  %583 = vmatprep.subr.mxu1 %v794_v1  ;;  %v354_v12 = vld [vmem:[#allocation7 + $0x38] sm:$0xff] }
  0x39   :  { %546 = vmatprep.subr.mxu0 %v794_v1  ;;  %584 = vmatpush3.msra.mxu1 %v251_v24 }
  0x3a   :  { %547 = vmatpush3.msra.mxu0 %v143_v13  ;;  %585 = vmatprep.subr.mxu1 %v794_v1  ;;  %v353_v13 = vld [vmem:[#allocation7 + $0x30] sm:$0xff] }
  0x3b   :  { %548 = vmatprep.subr.mxu0 %v794_v1  ;;  %586 = vmatpush3.msra.mxu1 %v250_v26 }
  0x3c   :  { %549 = vmatpush3.msra.mxu0 %v142_v14  ;;  %587 = vmatprep.subr.mxu1 %v794_v1  ;;  %v352_v14 = vld [vmem:[#allocation7 + $0x28] sm:$0xff] }
  0x3d   :  { %550 = vmatprep.subr.mxu0 %v794_v1  ;;  %588 = vmatpush3.msra.mxu1 %v249_v28 }
  0x3e   :  { %551 = vmatpush3.msra.mxu0 %v141_v17  ;;  %589 = vmatprep.subr.mxu1 %v794_v1  ;;  %v472_v17 = vld [vmem:[%s982_s4] ss:$0 sm:$0xff] }
  0x3f   :  { %552 = vmatprep.subr.mxu0 %v794_v1  ;;  %590 = vmatpush3.msra.mxu1 %v248_v30  ;;  %v349_v30 = vld [vmem:[#allocation7 + $0x10] sm:$0xff] }
  0x40   :  { %553 = vmatpush3.msra.mxu0 %v140_v19  ;;  %591 = vmatprep.subr.mxu1 %v794_v1 }
  0x41   :  { %554 = vmatprep.subr.mxu0 %v794_v1  ;;  %592 = vmatpush3.msra.mxu1 %v247_v31  ;;  %v348_v31 = vld [vmem:[#allocation7 + $0x8] sm:$0xff] }
  0x42   :  { %555 = vmatpush3.msra.mxu0 %v139_v21  ;;  %593 = vmatprep.subr.mxu1 %v794_v1 }
  0x43   :  { %556 = vmatprep.subr.mxu0 %v794_v1  ;;  %594 = vmatpush3.msra.mxu1 %v246_v32  ;;  %v347_v32 = vld [vmem:[#allocation7] sm:$0xff] }
  0x44   :  { %557 = vmatpush3.msra.mxu0 %v138_v23  ;;  %595 = vmatprep.subr.mxu1 %v794_v1 }
  0x45   :  { %558 = vmatprep.subr.mxu0 %v794_v1  ;;  %596 = vmatpush3.msra.mxu1 %v245_v33  ;;  %v473_v33 = vld [vmem:[%s984_s6] ss:$0 sm:$0xff] }
  0x46   :  { %559 = vmatpush3.msra.mxu0 %v137_v25  ;;  %597 = vmatprep.subr.mxu1 %v794_v1 }
  0x47   :  { %560 = vmatprep.subr.mxu0 %v794_v1  ;;  %598 = vmatpush3.msra.mxu1 %v244_v34 }
  0x48   :  { %561 = vmatpush3.msra.mxu0 %v136_v27  ;;  %599 = vmatprep.subr.mxu1 %v794_v1 }
  0x49   :  { %562 = vmatprep.subr.mxu0 %v794_v1  ;;  %600 = vmatpush3.msra.mxu1 %v243_v0 }
  0x4a   :  { %563 = vmatpush3.msra.mxu0 %v135_v29  ;;  %601 = vmatprep.subr.mxu1 %v794_v1 }
  0x4b   :  { %614 = vmatprep.subr.mxu0 %v794_v1  ;;  %602 = vmatpush3.msra.mxu1 %v242_v2 }
  0x4c   :  { %603 = vmatprep.subr.mxu1 %v794_v1 }
  0x4d   :  { %604 = vmatpush3.msra.mxu1 %v241_v3 }
  0x4e   :  { %655 = vmatprep.subr.mxu1 %v794_v1 }
  0xa3   :  { %v81_v40 = vpop.permute.xlu0 %80  ;;  %v86_v41 = vpop.permute.xlu1 %85 }
  0xa4   :  { %v97_v46 = vmul.f32 %v96_v42, %v81_v40  ;;  %v98_v47 = vmul.f32 %v96_v42, %v86_v41 }
  0xa8   :  { %v106_v44 = vpop.permute.xlu1 %105  ;;  %v102_v45 = vpop.permute.xlu0 %101 }
  0xa9   :  { %v117_v48 = vmul.f32 %v115_v43, %v106_v44  ;;  %v116_v49 = vmul.f32 %v115_v43, %v102_v45 }
  0xab   :  { %v120_v51 = vadd.f32 %v117_v48, %v98_v47  ;;  %v119_v52 = vadd.f32 %v116_v49, %v97_v46  ;;  %v474_v46 = vld [vmem:[%s986_s8] ss:$0 sm:$0xff] }
  0xac   :  { %v110_v53 = vpop.permute.xlu0 %109 }
  0xad   :  { %v118_v54 = vmul.f32 %v115_v43, %v110_v53  ;;  %v91_v55 = vpop.permute.xlu1 %90  ;;  %v129_v56 = vadd.f32 %v471_v50, %v119_v52  ;;  %v130_v59 = vadd.f32 %v471_v50, %v120_v51 }
  0xae   :  { %v99_v57 = vmul.f32 %v96_v42, %v91_v55 }
  0xaf   :  { %v132_v58 = vmax.f32 %v129_v56, 0.0  ;;  %v133_v61 = vmax.f32 %v130_v59, 0.0 }
  0xb0   :  { %v121_v60 = vadd.f32 %v118_v54, %v99_v57 }
  0xb1   :  { %565 = vmatmul.mubr.f32.vlgmr.msra.gmra.mxu0 %v132_v58 }
  0xb2   :  { %567 = vmatprep.mubr.msk.f32.mxu0 %vm796_vm0, %v794_v1  ;;  %v131_v62 = vadd.f32 %v471_v50, %v121_v60  ;;  %615 = vmatpush3.msra.mxu0 %v362_v4 }
  0xb3   :  { %616 = vmatprep.subr.mxu0 %v794_v1 }
  0xb4   :  { %v134_v63 = vmax.f32 %v131_v62, 0.0  ;;  %617 = vmatpush3.msra.mxu0 %v361_v5 }
  0xb5   :  { %568 = vmatmul.mubr.f32.gmra.mxu0 %v133_v61  ;;  %618 = vmatprep.subr.mxu0 %v794_v1 }
  0xb6   :  { %570 = vmatprep.mubr.msk.f32.mxu0 %vm796_vm0, %v794_v1  ;;  %619 = vmatpush3.msra.mxu0 %v360_v6 }
  0xb7   :  { %620 = vmatprep.subr.mxu0 %v794_v1 }
  0xb8   :  { %621 = vmatpush3.msra.mxu0 %v359_v7 }
  0xb9   :  { %571 = vmatmul.mubr.f32.gmra.mxu0 %v134_v63  ;;  %622 = vmatprep.subr.mxu0 %v794_v1 }
  0xba   :  { %646 = vmatprep.mubr.msk.f32.mxu0 %vm796_vm0, %v794_v1  ;;  %623 = vmatpush3.msra.mxu0 %v358_v8 }
  0xbb   :  { %624 = vmatprep.subr.mxu0 %v794_v1 }
  0xbc   :  { %625 = vmatpush3.msra.mxu0 %v357_v9 }
  0xbd   :  { %626 = vmatprep.subr.mxu0 %v794_v1 }
  0xbe   :  { %627 = vmatpush3.msra.mxu0 %v356_v10 }
  0xbf   :  { %628 = vmatprep.subr.mxu0 %v794_v1 }
  0xc0   :  { %629 = vmatpush3.msra.mxu0 %v355_v11 }
  0xc1   :  { %630 = vmatprep.subr.mxu0 %v794_v1 }
  0xc2   :  { %631 = vmatpush3.msra.mxu0 %v354_v12 }
  0xc3   :  { %632 = vmatprep.subr.mxu0 %v794_v1 }
  0xc4   :  { %633 = vmatpush3.msra.mxu0 %v353_v13 }
  0xc5   :  { %634 = vmatprep.subr.mxu0 %v794_v1 }
  0xc6   :  { %635 = vmatpush3.msra.mxu0 %v352_v14 }
  0xc7   :  { %636 = vmatprep.subr.mxu0 %v794_v1 }
  0xc8   :  { %637 = vmatpush3.msra.mxu0 %v351_v15 }
  0xc9   :  { %638 = vmatprep.subr.mxu0 %v794_v1 }
  0xca   :  { %639 = vmatpush3.msra.mxu0 %v350_v16 }
  0xcb   :  { %640 = vmatprep.subr.mxu0 %v794_v1 }
  0xcc   :  { %641 = vmatpush3.msra.mxu0 %v349_v30 }
  0xcd   :  { %642 = vmatprep.subr.mxu0 %v794_v1 }
  0xce   :  { %643 = vmatpush3.msra.mxu0 %v348_v31 }
  0xcf   :  { %644 = vmatprep.subr.mxu0 %v794_v1 }
  0xd0   :  { %645 = vmatpush3.msra.mxu0 %v347_v32 }
 0x171   :  { %v224_v18 = vpop.f32.mrf.mxu0 }
 0x172   :  { %v225_v19 = vadd.f32 %v472_v17, %v224_v18 }
 0x173   :  { %v566_v20 = vpop.f32.mrf.mxu0 }
 0x174   :  { %v238_v21 = vmax.f32 %v225_v19, 0.0 }
 0x175   :  { %v229_v22 = vpop.f32.mrf.mxu0 }
 0x176   :  { %v230_v23 = vadd.f32 %v472_v17, %v229_v22  ;;  %606 = vmatmul.mubr.f32.vlgmr.msra.gmra.mxu1 %v238_v21 }
 0x177   :  { %v569_v24 = vpop.f32.mrf.mxu0  ;;  %608 = vmatprep.mubr.msk.f32.mxu1 %vm796_vm0, %v794_v1  ;;  %671 = vmatpush3.msra.mxu1 %v362_v4 }
 0x178   :  { %v239_v25 = vmax.f32 %v230_v23, 0.0  ;;  %656 = vmatprep.subr.mxu1 %v794_v1 }
 0x179   :  { %v234_v26 = vpop.f32.mrf.mxu0  ;;  %672 = vmatpush3.msra.mxu1 %v361_v5 }
 0x17a   :  { %v235_v27 = vadd.f32 %v472_v17, %v234_v26  ;;  %609 = vmatmul.mubr.f32.gmra.mxu1 %v239_v25  ;;  %657 = vmatprep.subr.mxu1 %v794_v1 }
 0x17b   :  { %v572_v28 = vpop.f32.mrf.mxu0  ;;  %611 = vmatprep.mubr.msk.f32.mxu1 %vm796_vm0, %v794_v1  ;;  %673 = vmatpush3.msra.mxu1 %v360_v6 }
 0x17c   :  { %v240_v29 = vmax.f32 %v235_v27, 0.0  ;;  %658 = vmatprep.subr.mxu1 %v794_v1 }
 0x17d   :  { %674 = vmatpush3.msra.mxu1 %v359_v7 }
 0x17e   :  { %612 = vmatmul.mubr.f32.gmra.mxu1 %v240_v29  ;;  %659 = vmatprep.subr.mxu1 %v794_v1 }
 0x17f   :  { %675 = vmatpush3.msra.mxu1 %v358_v8  ;;  %649 = vmatprep.mubr.msk.f32.mxu1 %vm796_vm0, %v794_v1 }
 0x180   :  { %660 = vmatprep.subr.mxu1 %v794_v1 }
 0x181   :  { %676 = vmatpush3.msra.mxu1 %v357_v9 }
 0x182   :  { %661 = vmatprep.subr.mxu1 %v794_v1 }
 0x183   :  { %677 = vmatpush3.msra.mxu1 %v356_v10 }
 0x184   :  { %662 = vmatprep.subr.mxu1 %v794_v1 }
 0x185   :  { %678 = vmatpush3.msra.mxu1 %v355_v11 }
 0x186   :  { %663 = vmatprep.subr.mxu1 %v794_v1 }
 0x187   :  { %679 = vmatpush3.msra.mxu1 %v354_v12 }
 0x188   :  { %664 = vmatprep.subr.mxu1 %v794_v1 }
 0x189   :  { %680 = vmatpush3.msra.mxu1 %v353_v13 }
 0x18a   :  { %665 = vmatprep.subr.mxu1 %v794_v1 }
 0x18b   :  { %681 = vmatpush3.msra.mxu1 %v352_v14 }
 0x18c   :  { %666 = vmatprep.subr.mxu1 %v794_v1 }
 0x18d   :  { %682 = vmatpush3.msra.mxu1 %v351_v15 }
 0x18e   :  { %667 = vmatprep.subr.mxu1 %v794_v1 }
 0x18f   :  { %683 = vmatpush3.msra.mxu1 %v350_v16 }
 0x190   :  { %668 = vmatprep.subr.mxu1 %v794_v1 }
 0x191   :  { %684 = vmatpush3.msra.mxu1 %v349_v30 }
 0x192   :  { %669 = vmatprep.subr.mxu1 %v794_v1 }
 0x193   :  { %685 = vmatpush3.msra.mxu1 %v348_v31 }
 0x194   :  { %670 = vmatprep.subr.mxu1 %v794_v1 }
 0x195   :  { %686 = vmatpush3.msra.mxu1 %v347_v32 }
 0x236   :  { %v330_v34 = vpop.f32.mrf.mxu1 }
 0x237   :  { %v331_v35 = vadd.f32 %v473_v33, %v330_v34 }
 0x238   :  { %v607_v36 = vpop.f32.mrf.mxu1 }
 0x239   :  { %v344_v37 = vmax.f32 %v331_v35, 0.0 }
 0x23a   :  { %v335_v38 = vpop.f32.mrf.mxu1 }
 0x23b   :  { %v336_v39 = vadd.f32 %v473_v33, %v335_v38  ;;  %647 = vmatmul.mubr.f32.vlgmr.msra.gmra.mxu0 %v344_v37 }
 0x23c   :  { %v610_v40 = vpop.f32.mrf.mxu1 }
 0x23d   :  { %v345_v41 = vmax.f32 %v336_v39, 0.0 }
 0x23e   :  { %v340_v42 = vpop.f32.mrf.mxu1 }
 0x23f   :  { %v341_v43 = vadd.f32 %v473_v33, %v340_v42  ;;  %650 = vmatmul.mubr.f32.vlgmr.msra.gmra.mxu1 %v345_v41 }
 0x240   :  { %v613_v44 = vpop.f32.mrf.mxu1  ;;  %652 = vmatprep.mubr.msk.f32.mxu1 %vm796_vm0, %v794_v1 }
 0x241   :  { %v346_v45 = vmax.f32 %v341_v43, 0.0 }
 0x243   :  { %653 = vmatmul.mubr.f32.gmra.mxu1 %v346_v45 }
 0x2fb   :  { %v436_v47 = vpop.f32.mrf.mxu0 }
 0x2fc   :  { %v437_v48 = vadd.f32 %v474_v46, %v436_v47 }
 0x2fd   :  { %v648_v49 = vpop.f32.mrf.mxu0 }
 0x2fe   :  { %450 = vst [vmem:[#allocation8] sm:$0xff] %v437_v48 }
 0x2ff   :  { %v441_v50 = vpop.f32.mrf.mxu1 }
 0x300   :  { %v442_v51 = vadd.f32 %v474_v46, %v441_v50 }
 0x301   :  { %v651_v52 = vpop.f32.mrf.mxu1 }
 0x302   :  { %451 = vst [vmem:[#allocation8 + $0x8] sm:$0xff] %v442_v51 }
 0x303   :  { %v446_v53 = vpop.f32.mrf.mxu1 }
 0x304   :  { %v447_v54 = vadd.f32 %v474_v46, %v446_v53 }
 0x305   :  { %v654_v1 = vpop.f32.mrf.mxu1 }
 0x306   :  { %452 = vst [vmem:[#allocation8 + $0x10] sm:$0x7f] %v447_v54 }
 0x307   :  { %773 = shalt.err (!%p770_p5)
}
 0x308   :  { %464 = dma.vmem_to_hbm [thread:$0]  %s459_s16, 384, %s987_s9, [#allocation4], %s790_s14, %s790_s14, %s791_s15  }
 0x309   :  { %786 = dma.done.wait [#allocation4], 384  }
 0x30a   :  { %787 = vsyncadd [#allocation4], 4294966912 }
 0x30b   :  { %468 = vsyncpa [#allocation3], 1 }
 0x30c   :  { %469 = vsyncpa [#allocation6], 1 }
 0x30d   :  { %470 = vsyncpa [#allocation4], 1 }

</bundles_post_ra>
